<compile_context>
chip_gen: v5e
topology: v5e:2x2
jax: 0.10.0
libtpu: 0.0.40
codegen_flags: <defaults>
</compile_context>

<pallas_src>
import math
import functools

import jax
import jax.numpy as jnp
from jax.experimental import pallas as pl
from jax.experimental.pallas import tpu as pltpu


def _round_up(x, m):
    return (x + m - 1) // m * m


def _attention_kernel(
    q_ref, k_ref, v_ref, mask_ref,
    wq_ref, bq_ref, wk_ref, bk_ref, wv_ref, bv_ref, wo_ref, bo_ref,
    out_ref, attn_ref,
    *, flatten,
):
    bt, s, dp = q_ref.shape          # (Bt, S, Dp); Dp is a multiple of 128
    n = bt * s

    # ---- Q/K/V projections on folded (Bt*S, Dp) rows: bf16 MXU, f32 accumulate.
    #      1/sqrt(d_k) is pre-folded into Wq/bq by the wrapper.
    q2 = q_ref[...].reshape(n, dp).astype(jnp.bfloat16)
    k2 = k_ref[...].reshape(n, dp).astype(jnp.bfloat16)
    v2 = v_ref[...].reshape(n, dp).astype(jnp.bfloat16)

    qp = jnp.dot(q2, wq_ref[...], preferred_element_type=jnp.float32) + bq_ref[...]
    kp = jnp.dot(k2, wk_ref[...], preferred_element_type=jnp.float32) + bk_ref[...]
    vp = jnp.dot(v2, wv_ref[...], preferred_element_type=jnp.float32) + bv_ref[...]

    if flatten:
        # Fill the MXU: one (n,Dp)x(Dp,n) score matmul and one (n,n)x(n,Dp)
        # context matmul instead of Bt tiny batched matmuls. Cross-batch score
        # entries are killed by the precomputed block-diagonal additive mask, so
        # the context matmul over all n keys still yields the per-batch result.
        qf = qp.astype(jnp.bfloat16)
        kf = kp.astype(jnp.bfloat16)
        vf = vp.astype(jnp.bfloat16)
        # K-transpose expressed inside the contraction (no explicit transpose)
        scores = jax.lax.dot_general(qf, kf, (((1,), (1,)), ((), ())),
                                     preferred_element_type=jnp.float32)
        scores = scores + mask_ref[0]                       # (n, n) additive mask

        m = jnp.max(scores, axis=-1, keepdims=True)
        e = jnp.exp(scores - m)
        denom = jnp.sum(e, axis=-1, keepdims=True)
        p = e / denom                                       # exact: p is returned

        ctx = jnp.dot(p.astype(jnp.bfloat16), vf, preferred_element_type=jnp.float32)
        out2 = jnp.dot(ctx.astype(jnp.bfloat16), wo_ref[...],
                       preferred_element_type=jnp.float32) + bo_ref[...]
        out_ref[...] = out2.reshape(bt, s, dp).astype(out_ref.dtype)

        # extract the per-batch (S, S) diagonal blocks of the flattened weights
        for b in range(bt):
            attn_ref[b] = p[b * s:(b + 1) * s, b * s:(b + 1) * s].astype(attn_ref.dtype)
    else:
        # batched fallback for large Bt*S (each matmul already has enough rows)
        q3 = qp.reshape(bt, s, dp).astype(jnp.bfloat16)
        k3 = kp.reshape(bt, s, dp).astype(jnp.bfloat16)
        v3 = vp.reshape(bt, s, dp).astype(jnp.bfloat16)

        scores = jnp.einsum('bqd,bkd->bqk', q3, k3,
                            preferred_element_type=jnp.float32)
        scores = scores + mask_ref[...]                     # (Bt, 1, S) additive

        m = jnp.max(scores, axis=-1, keepdims=True)
        e = jnp.exp(scores - m)
        denom = jnp.sum(e, axis=-1, keepdims=True)
        p = e / denom

        ctx = jnp.einsum('bqk,bkd->bqd', p.astype(jnp.bfloat16), v3,
                         preferred_element_type=jnp.float32)
        out2 = jnp.dot(ctx.reshape(n, dp).astype(jnp.bfloat16), wo_ref[...],
                       preferred_element_type=jnp.float32) + bo_ref[...]
        out_ref[...] = out2.reshape(bt, s, dp).astype(out_ref.dtype)
        attn_ref[...] = p.astype(attn_ref.dtype)


def _vmem_estimate_bytes(bt, S, Dp):
    """Rough per-grid-step VMEM footprint (double-buffered IO + live values)."""
    n = bt * S
    f32, bf16 = 4, 2
    sk = n if n <= 256 else S                               # score width (flatten vs batched)
    io = 2 * (3 * n * Dp * f32 + max(n * sk, n) * f32)      # in: q/k/v + mask
    io += 2 * (n * Dp * f32 + n * S * f32)                  # out: out + attn
    wts = 2 * (4 * Dp * Dp * bf16 + 4 * Dp * f32)           # weights + biases
    live = 6 * n * Dp * f32 + 4 * n * sk * f32              # proj acts + scores/e/p/ctx
    return io + wts + live


def _pick_block_b(B, S, Dp, budget_bytes=24 << 20):
    """Largest divisor of B that leaves >= 2 grid steps and fits the VMEM budget."""
    divisors = [d for d in range(1, B + 1) if B % d == 0]
    cands = sorted((d for d in divisors if d <= max(1, B // 2)), reverse=True)
    for d in (cands or [1]):
        if _vmem_estimate_bytes(d, S, Dp) <= budget_bytes:
            return d
    return 1


def attention(q, k, v, mask, params, *, block_b=None):
    """q/k/v: (B, S, D) f32; mask: (B, S) int (1 keep, 0 mask).
    Returns (output (B, S, D) f32, attention_weights (B, S, S) f32)."""
    B, S, D = q.shape
    # TODO(synk): S not a multiple of 8 would need a sublane-padded fold path.
    assert S % 8 == 0, "S must be a multiple of 8 (sublane)"

    Dp = _round_up(D, 128)          # lane-dense activations/weights/output (300 -> 384)
    scale = 1.0 / math.sqrt(D)      # d_k = d_model (original, unpadded)

    if block_b is None:
        # >= 2 grid steps: gives the auto-pipeline DMAs to hide and lets the
        # "parallel" axis shard across v7x's 2 TCs; capped by a conservative
        # (v5e scoped / v7x physical friendly) per-step VMEM budget.
        block_b = _pick_block_b(B, S, Dp)
    assert B % block_b == 0, "block_b must divide B"
    nb = B // block_b

    # fill the MXU with one (Bt*S)-row matmul when the per-batch matmuls are tiny
    flatten = block_b * S <= 256

    # ---- wrapper-side prep: pad D -> Dp, transpose weights, fold 1/sqrt(d_k) ----
    pad_d = Dp - D

    def padx(x):                                    # (B,S,D) -> (B,S,Dp)
        return jnp.pad(x, ((0, 0), (0, 0), (0, pad_d))) if pad_d else x

    def wmat(w, sc=1.0):                            # torch Linear (out,in) -> (Dp,Dp) bf16
        wt = (w.astype(jnp.float32) * sc).T
        if pad_d:
            wt = jnp.pad(wt, ((0, pad_d), (0, pad_d)))
        return wt.astype(jnp.bfloat16)

    def brow(b, sc=1.0):                            # (D,) -> (1, Dp) f32
        bb = b.astype(jnp.float32) * sc
        if pad_d:
            bb = jnp.pad(bb, (0, pad_d))
        return bb.reshape(1, Dp)

    # additive padding mask: 0 keep, -1e9 mask (replaces in-kernel compare+select)
    mask_add = (mask.astype(jnp.float32) - 1.0) * 1e9              # (B, S)
    if flatten:
        n = block_b * S
        bidx = jnp.arange(n, dtype=jnp.int32) // S
        block_diag = jnp.where(bidx[:, None] == bidx[None, :],
                               0.0, -1e9).astype(jnp.float32)      # (n, n)
        mask_arr = mask_add.reshape(nb, 1, n) + block_diag[None]   # (nb, n, n)
        mask_spec = pl.BlockSpec((1, n, n), lambda b: (b, 0, 0))
    else:
        mask_arr = mask_add.reshape(B, 1, S)                       # (B, 1, S)
        mask_spec = pl.BlockSpec((block_b, 1, S), lambda b: (b, 0, 0))

    args = (
        padx(q), padx(k), padx(v), mask_arr,
        wmat(params["wq"], scale), brow(params["bq"], scale),
        wmat(params["wk"]), brow(params["bk"]),
        wmat(params["wv"]), brow(params["bv"]),
        wmat(params["wo"]), brow(params["bo"]),
    )

    def const_spec(a):                               # weights/biases stay resident
        nd = a.ndim
        return pl.BlockSpec(a.shape, lambda b, _nd=nd: (0,) * _nd)

    in_specs = [
        pl.BlockSpec((block_b, S, Dp), lambda b: (b, 0, 0)),   # q
        pl.BlockSpec((block_b, S, Dp), lambda b: (b, 0, 0)),   # k
        pl.BlockSpec((block_b, S, Dp), lambda b: (b, 0, 0)),   # v
        mask_spec,
    ] + [const_spec(a) for a in args[4:]]

    out_specs = (
        pl.BlockSpec((block_b, S, Dp), lambda b: (b, 0, 0)),   # out (lane-dense Dp)
        pl.BlockSpec((block_b, S, S), lambda b: (b, 0, 0)),    # attention weights
    )

    # explicit VMEM limit: safe on every generation (v7x scoped default is 32 MiB)
    vmem_limit = int(min(max(2 * _vmem_estimate_bytes(block_b, S, Dp), 32 << 20),
                         64 << 20))

    # advisory cost so XLA schedules surrounding ops around the custom call
    n_keys = block_b * S if flatten else S
    cost = pl.CostEstimate(
        flops=int(8 * B * S * Dp * Dp + 4 * B * S * n_keys * Dp),
        transcendentals=int(B * S * n_keys),
        bytes_accessed=int((3 * B * S * Dp + B * S) * 4
                           + 4 * Dp * Dp * 2 + 4 * Dp * 4
                           + (B * S * Dp + B * S * S) * 4),
    )

    kernel = functools.partial(_attention_kernel, flatten=flatten)

    out_p, attn = pl.pallas_call(
        kernel,
        out_shape=(
            jax.ShapeDtypeStruct((B, S, Dp), jnp.float32),
            jax.ShapeDtypeStruct((B, S, S), jnp.float32),
        ),
        grid_spec=pltpu.PrefetchScalarGridSpec(
            num_scalar_prefetch=0,
            grid=(nb,),
            in_specs=in_specs,
            out_specs=out_specs,
        ),
        compiler_params=pltpu.CompilerParams(
            dimension_semantics=("parallel",),     # batch steps are independent
            vmem_limit_bytes=vmem_limit,
        ),
        cost_estimate=cost,
    )(*args)

    out = out_p[..., :D] if pad_d else out_p
    return out, attn


def _reference(q, k, v, mask, p):
    """Pure-JAX f32 reference of the PyTorch Attention.forward."""
    hp = jax.lax.Precision.HIGHEST
    D = q.shape[-1]
    qp = jnp.einsum("bsd,ed->bse", q, p["wq"], precision=hp) + p["bq"]
    kp = jnp.einsum("bsd,ed->bse", k, p["wk"], precision=hp) + p["bk"]
    vp = jnp.einsum("bsd,ed->bse", v, p["wv"], precision=hp) + p["bv"]
    w = jnp.einsum("bqd,bkd->bqk", qp, kp, precision=hp) / math.sqrt(D)
    w = jnp.where(mask[:, None, :] == 0, -1e9, w)
    pw = jax.nn.softmax(w, axis=-1)
    ctx = jnp.einsum("bqk,bkd->bqd", pw, vp, precision=hp)
    out = jnp.einsum("bsd,ed->bse", ctx, p["wo"], precision=hp) + p["bo"]
    return out, pw


if __name__ == "__main__":
    B, S, D = 2, 8, 32   # small d_model stand-in for the default 300

    key = jax.random.PRNGKey(0)
    keys = jax.random.split(key, 12)

    params = {
        "wq": jax.random.normal(keys[0], (D, D), jnp.float32) * 0.1,
        "bq": jax.random.normal(keys[1], (D,), jnp.float32) * 0.1,
        "wk": jax.random.normal(keys[2], (D, D), jnp.float32) * 0.1,
        "bk": jax.random.normal(keys[3], (D,), jnp.float32) * 0.1,
        "wv": jax.random.normal(keys[4], (D, D), jnp.float32) * 0.1,
        "bv": jax.random.normal(keys[5], (D,), jnp.float32) * 0.1,
        "wo": jax.random.normal(keys[6], (D, D), jnp.float32) * 0.1,
        "bo": jax.random.normal(keys[7], (D,), jnp.float32) * 0.1,
    }

    q = jax.random.normal(keys[8], (B, S, D), jnp.float32)
    k = jax.random.normal(keys[9], (B, S, D), jnp.float32)
    v = jax.random.normal(keys[10], (B, S, D), jnp.float32)

    # padding-style mask: batch 0 attends to all 8 keys, batch 1 only the first 5
    lens = jnp.array([8, 5], jnp.int32)
    mask = (jnp.arange(S)[None, :] < lens[:, None]).astype(jnp.int32)

    ref_out, ref_attn = _reference(q, k, v, mask, params)

    # default path: block_b=1 -> grid=(2,), pipelined + parallel batch steps
    out, attn = attention(q, k, v, mask, params)
    out, attn = jax.block_until_ready((out, attn))
    assert jnp.allclose(out, ref_out, rtol=1e-2, atol=1e-2), "output mismatch"
    assert jnp.allclose(attn, ref_attn, rtol=1e-2, atol=1e-2), "attention mismatch"

    # also exercise the multi-batch flattened-MXU path (Bt=2, block-diagonal mask)
    out2, attn2 = attention(q, k, v, mask, params, block_b=2)
    out2, attn2 = jax.block_until_ready((out2, attn2))
    assert jnp.allclose(out2, ref_out, rtol=1e-2, atol=1e-2), "output mismatch (Bt=2)"
    assert jnp.allclose(attn2, ref_attn, rtol=1e-2, atol=1e-2), "attention mismatch (Bt=2)"

    print("KERNEL_OK")
</pallas_src>

<mosaic_0001>
module attributes {stable_mosaic.version = 11 : i64} {
  func.func @_attention_kernel(%arg0: i32, %arg1: memref<1x8x128xf32, #tpu.memory_space<vmem>>, %arg2: memref<1x8x128xf32, #tpu.memory_space<vmem>>, %arg3: memref<1x8x128xf32, #tpu.memory_space<vmem>>, %arg4: memref<1x8x8xf32, #tpu.memory_space<vmem>>, %arg5: memref<128x128xbf16, #tpu.memory_space<vmem>>, %arg6: memref<1x128xf32, #tpu.memory_space<vmem>>, %arg7: memref<128x128xbf16, #tpu.memory_space<vmem>>, %arg8: memref<1x128xf32, #tpu.memory_space<vmem>>, %arg9: memref<128x128xbf16, #tpu.memory_space<vmem>>, %arg10: memref<1x128xf32, #tpu.memory_space<vmem>>, %arg11: memref<128x128xbf16, #tpu.memory_space<vmem>>, %arg12: memref<1x128xf32, #tpu.memory_space<vmem>>, %arg13: memref<1x8x128xf32, #tpu.memory_space<vmem>>, %arg14: memref<1x8x8xf32, #tpu.memory_space<vmem>>) attributes {dimension_semantics = [#tpu.dimension_semantics<parallel>], iteration_bounds = array<i64: 2>, scalar_prefetch = 0 : i64, scratch_operands = 0 : i64, tpu.core_type = #tpu.core_type<tc>, window_params = [{transform_indices = @transform_0, window_bounds = array<i64: 1, 8, 128>}, {transform_indices = @transform_1, window_bounds = array<i64: 1, 8, 128>}, {transform_indices = @transform_2, window_bounds = array<i64: 1, 8, 128>}, {transform_indices = @transform_3, window_bounds = array<i64: 1, 8, 8>}, {pipeline_mode = #tpu.pipeline_mode<synchronous>, transform_indices = @transform_4, window_bounds = array<i64: 128, 128>}, {pipeline_mode = #tpu.pipeline_mode<synchronous>, transform_indices = @transform_5, window_bounds = array<i64: 1, 128>}, {pipeline_mode = #tpu.pipeline_mode<synchronous>, transform_indices = @transform_6, window_bounds = array<i64: 128, 128>}, {pipeline_mode = #tpu.pipeline_mode<synchronous>, transform_indices = @transform_7, window_bounds = array<i64: 1, 128>}, {pipeline_mode = #tpu.pipeline_mode<synchronous>, transform_indices = @transform_8, window_bounds = array<i64: 128, 128>}, {pipeline_mode = #tpu.pipeline_mode<synchronous>, transform_indices = @transform_9, window_bounds = array<i64: 1, 128>}, {pipeline_mode = #tpu.pipeline_mode<synchronous>, transform_indices = @transform_10, window_bounds = array<i64: 128, 128>}, {pipeline_mode = #tpu.pipeline_mode<synchronous>, transform_indices = @transform_11, window_bounds = array<i64: 1, 128>}, {transform_indices = @transform_12, window_bounds = array<i64: 1, 8, 128>}, {transform_indices = @transform_13, window_bounds = array<i64: 1, 8, 8>}]} {
    %c0 = arith.constant 0 : index
    %c0_0 = arith.constant 0 : index
    %c0_1 = arith.constant 0 : index
    %0 = vector.load %arg1[%c0, %c0_0, %c0_1] : memref<1x8x128xf32, #tpu.memory_space<vmem>>, vector<1x8x128xf32>
    %1 = vector.shape_cast %0 : vector<1x8x128xf32> to vector<8x128xf32>
    %2 = arith.truncf %1 : vector<8x128xf32> to vector<8x128xbf16>
    %c0_2 = arith.constant 0 : index
    %c0_3 = arith.constant 0 : index
    %c0_4 = arith.constant 0 : index
    %3 = vector.load %arg2[%c0_2, %c0_3, %c0_4] : memref<1x8x128xf32, #tpu.memory_space<vmem>>, vector<1x8x128xf32>
    %4 = vector.shape_cast %3 : vector<1x8x128xf32> to vector<8x128xf32>
    %5 = arith.truncf %4 : vector<8x128xf32> to vector<8x128xbf16>
    %c0_5 = arith.constant 0 : index
    %c0_6 = arith.constant 0 : index
    %c0_7 = arith.constant 0 : index
    %6 = vector.load %arg3[%c0_5, %c0_6, %c0_7] : memref<1x8x128xf32, #tpu.memory_space<vmem>>, vector<1x8x128xf32>
    %7 = vector.shape_cast %6 : vector<1x8x128xf32> to vector<8x128xf32>
    %8 = arith.truncf %7 : vector<8x128xf32> to vector<8x128xbf16>
    %c0_8 = arith.constant 0 : index
    %c0_9 = arith.constant 0 : index
    %9 = vector.load %arg5[%c0_8, %c0_9] : memref<128x128xbf16, #tpu.memory_space<vmem>>, vector<128x128xbf16>
    %cst = arith.constant dense<0.000000e+00> : vector<8x128xf32>
    %10 = tpu.matmul %2, %9, %cst {dimension_numbers = #tpu.dot_dimension_numbers<[1], [0], [0], [1], [0, 0, 1, 1], [], []>} : vector<8x128xbf16>, vector<128x128xbf16>, vector<8x128xf32> -> vector<8x128xf32>
    %c0_10 = arith.constant 0 : index
    %c0_11 = arith.constant 0 : index
    %11 = vector.load %arg6[%c0_10, %c0_11] : memref<1x128xf32, #tpu.memory_space<vmem>>, vector<1x128xf32>
    %12 = vector.broadcast %11 : vector<1x128xf32> to vector<8x128xf32>
    %13 = arith.addf %10, %12 : vector<8x128xf32>
    %c0_12 = arith.constant 0 : index
    %c0_13 = arith.constant 0 : index
    %14 = vector.load %arg7[%c0_12, %c0_13] : memref<128x128xbf16, #tpu.memory_space<vmem>>, vector<128x128xbf16>
    %cst_14 = arith.constant dense<0.000000e+00> : vector<8x128xf32>
    %15 = tpu.matmul %5, %14, %cst_14 {dimension_numbers = #tpu.dot_dimension_numbers<[1], [0], [0], [1], [0, 0, 1, 1], [], []>} : vector<8x128xbf16>, vector<128x128xbf16>, vector<8x128xf32> -> vector<8x128xf32>
    %c0_15 = arith.constant 0 : index
    %c0_16 = arith.constant 0 : index
    %16 = vector.load %arg8[%c0_15, %c0_16] : memref<1x128xf32, #tpu.memory_space<vmem>>, vector<1x128xf32>
    %17 = vector.broadcast %16 : vector<1x128xf32> to vector<8x128xf32>
    %18 = arith.addf %15, %17 : vector<8x128xf32>
    %c0_17 = arith.constant 0 : index
    %c0_18 = arith.constant 0 : index
    %19 = vector.load %arg9[%c0_17, %c0_18] : memref<128x128xbf16, #tpu.memory_space<vmem>>, vector<128x128xbf16>
    %cst_19 = arith.constant dense<0.000000e+00> : vector<8x128xf32>
    %20 = tpu.matmul %8, %19, %cst_19 {dimension_numbers = #tpu.dot_dimension_numbers<[1], [0], [0], [1], [0, 0, 1, 1], [], []>} : vector<8x128xbf16>, vector<128x128xbf16>, vector<8x128xf32> -> vector<8x128xf32>
    %c0_20 = arith.constant 0 : index
    %c0_21 = arith.constant 0 : index
    %21 = vector.load %arg10[%c0_20, %c0_21] : memref<1x128xf32, #tpu.memory_space<vmem>>, vector<1x128xf32>
    %22 = vector.broadcast %21 : vector<1x128xf32> to vector<8x128xf32>
    %23 = arith.addf %20, %22 : vector<8x128xf32>
    %24 = arith.truncf %13 : vector<8x128xf32> to vector<8x128xbf16>
    %25 = arith.truncf %18 : vector<8x128xf32> to vector<8x128xbf16>
    %26 = arith.truncf %23 : vector<8x128xf32> to vector<8x128xbf16>
    %cst_22 = arith.constant dense<0.000000e+00> : vector<8x8xf32>
    %27 = tpu.matmul %24, %25, %cst_22 {dimension_numbers = #tpu.dot_dimension_numbers<[1], [1], [0], [0], [0, 0, 1, 0], [], []>} : vector<8x128xbf16>, vector<8x128xbf16>, vector<8x8xf32> -> vector<8x8xf32>
    %c0_23 = arith.constant 0 : index
    %c0_24 = arith.constant 0 : index
    %c0_25 = arith.constant 0 : index
    %28 = vector.load %arg4[%c0_23, %c0_24, %c0_25] : memref<1x8x8xf32, #tpu.memory_space<vmem>>, vector<1x8x8xf32>
    %29 = vector.shape_cast %28 : vector<1x8x8xf32> to vector<8x8xf32>
    %30 = arith.addf %27, %29 : vector<8x8xf32>
    %cst_26 = arith.constant dense<0xFF800000> : vector<8xf32>
    %31 = vector.multi_reduction <maximumf>, %30, %cst_26 [1] : vector<8x8xf32> to vector<8xf32>
    %32 = vector.shape_cast %31 : vector<8xf32> to vector<8x1xf32>
    %33 = vector.broadcast %32 : vector<8x1xf32> to vector<8x8xf32>
    %34 = arith.subf %30, %33 : vector<8x8xf32>
    %35 = math.exp %34 : vector<8x8xf32>
    %cst_27 = arith.constant dense<0.000000e+00> : vector<8xf32>
    %36 = vector.multi_reduction <add>, %35, %cst_27 [1] : vector<8x8xf32> to vector<8xf32>
    %37 = vector.shape_cast %36 : vector<8xf32> to vector<8x1xf32>
    %38 = vector.broadcast %37 : vector<8x1xf32> to vector<8x8xf32>
    %39 = arith.divf %35, %38 : vector<8x8xf32>
    %40 = arith.truncf %39 : vector<8x8xf32> to vector<8x8xbf16>
    %cst_28 = arith.constant dense<0.000000e+00> : vector<8x128xf32>
    %41 = tpu.matmul %40, %26, %cst_28 {dimension_numbers = #tpu.dot_dimension_numbers<[1], [0], [0], [1], [0, 0, 1, 1], [], []>} : vector<8x8xbf16>, vector<8x128xbf16>, vector<8x128xf32> -> vector<8x128xf32>
    %42 = arith.truncf %41 : vector<8x128xf32> to vector<8x128xbf16>
    %c0_29 = arith.constant 0 : index
    %c0_30 = arith.constant 0 : index
    %43 = vector.load %arg11[%c0_29, %c0_30] : memref<128x128xbf16, #tpu.memory_space<vmem>>, vector<128x128xbf16>
    %cst_31 = arith.constant dense<0.000000e+00> : vector<8x128xf32>
    %44 = tpu.matmul %42, %43, %cst_31 {dimension_numbers = #tpu.dot_dimension_numbers<[1], [0], [0], [1], [0, 0, 1, 1], [], []>} : vector<8x128xbf16>, vector<128x128xbf16>, vector<8x128xf32> -> vector<8x128xf32>
    %c0_32 = arith.constant 0 : index
    %c0_33 = arith.constant 0 : index
    %45 = vector.load %arg12[%c0_32, %c0_33] : memref<1x128xf32, #tpu.memory_space<vmem>>, vector<1x128xf32>
    %46 = vector.broadcast %45 : vector<1x128xf32> to vector<8x128xf32>
    %47 = arith.addf %44, %46 : vector<8x128xf32>
    %48 = vector.shape_cast %47 : vector<8x128xf32> to vector<1x8x128xf32>
    %c0_34 = arith.constant 0 : index
    %c0_35 = arith.constant 0 : index
    %c0_36 = arith.constant 0 : index
    %49 = vector.load %arg13[%c0_34, %c0_35, %c0_36] : memref<1x8x128xf32, #tpu.memory_space<vmem>>, vector<1x8x128xf32>
    tpu.vector_store %arg13[%c0_34, %c0_35, %c0_36], %48 {strides = array<i32>} : memref<1x8x128xf32, #tpu.memory_space<vmem>>, vector<1x8x128xf32>,
    %c0_37 = arith.constant 0 : index
    %c0_38 = arith.constant 0 : index
    %c0_39 = arith.constant 0 : index
    %50 = vector.load %arg14[%c0_37, %c0_38, %c0_39] : memref<1x8x8xf32, #tpu.memory_space<vmem>>, vector<1x8x8xf32>
    %51 = vector.shape_cast %50 : vector<1x8x8xf32> to vector<8x8xf32>
    %52 = vector.shape_cast %39 : vector<8x8xf32> to vector<1x8x8xf32>
    tpu.vector_store %arg14[%c0_37, %c0_38, %c0_39], %52 {strides = array<i32>} : memref<1x8x8xf32, #tpu.memory_space<vmem>>, vector<1x8x8xf32>,
    return
  }
  func.func @transform_0(%arg0: i32) -> (i32, i32, i32) {
    %c0_i32 = arith.constant 0 : i32
    %c0_i32_0 = arith.constant 0 : i32
    %c0_i32_1 = arith.constant 0 : i32
    return %arg0, %c0_i32, %c0_i32_0 : i32, i32, i32
  }
  func.func @transform_1(%arg0: i32) -> (i32, i32, i32) {
    %c0_i32 = arith.constant 0 : i32
    %c0_i32_0 = arith.constant 0 : i32
    %c0_i32_1 = arith.constant 0 : i32
    return %arg0, %c0_i32, %c0_i32_0 : i32, i32, i32
  }
  func.func @transform_2(%arg0: i32) -> (i32, i32, i32) {
    %c0_i32 = arith.constant 0 : i32
    %c0_i32_0 = arith.constant 0 : i32
    %c0_i32_1 = arith.constant 0 : i32
    return %arg0, %c0_i32, %c0_i32_0 : i32, i32, i32
  }
  func.func @transform_3(%arg0: i32) -> (i32, i32, i32) {
    %c0_i32 = arith.constant 0 : i32
    %c0_i32_0 = arith.constant 0 : i32
    %c0_i32_1 = arith.constant 0 : i32
    return %arg0, %c0_i32, %c0_i32_0 : i32, i32, i32
  }
  func.func @transform_4(%arg0: i32) -> (i32, i32) {
    %c0_i32 = arith.constant 0 : i32
    %c0_i32_0 = arith.constant 0 : i32
    %c0_i32_1 = arith.constant 0 : i32
    return %c0_i32, %c0_i32_0 : i32, i32
  }
  func.func @transform_5(%arg0: i32) -> (i32, i32) {
    %c0_i32 = arith.constant 0 : i32
    %c0_i32_0 = arith.constant 0 : i32
    %c0_i32_1 = arith.constant 0 : i32
    return %c0_i32, %c0_i32_0 : i32, i32
  }
  func.func @transform_6(%arg0: i32) -> (i32, i32) {
    %c0_i32 = arith.constant 0 : i32
    %c0_i32_0 = arith.constant 0 : i32
    %c0_i32_1 = arith.constant 0 : i32
    return %c0_i32, %c0_i32_0 : i32, i32
  }
  func.func @transform_7(%arg0: i32) -> (i32, i32) {
    %c0_i32 = arith.constant 0 : i32
    %c0_i32_0 = arith.constant 0 : i32
    %c0_i32_1 = arith.constant 0 : i32
    return %c0_i32, %c0_i32_0 : i32, i32
  }
  func.func @transform_8(%arg0: i32) -> (i32, i32) {
    %c0_i32 = arith.constant 0 : i32
    %c0_i32_0 = arith.constant 0 : i32
    %c0_i32_1 = arith.constant 0 : i32
    return %c0_i32, %c0_i32_0 : i32, i32
  }
  func.func @transform_9(%arg0: i32) -> (i32, i32) {
    %c0_i32 = arith.constant 0 : i32
    %c0_i32_0 = arith.constant 0 : i32
    %c0_i32_1 = arith.constant 0 : i32
    return %c0_i32, %c0_i32_0 : i32, i32
  }
  func.func @transform_10(%arg0: i32) -> (i32, i32) {
    %c0_i32 = arith.constant 0 : i32
    %c0_i32_0 = arith.constant 0 : i32
    %c0_i32_1 = arith.constant 0 : i32
    return %c0_i32, %c0_i32_0 : i32, i32
  }
  func.func @transform_11(%arg0: i32) -> (i32, i32) {
    %c0_i32 = arith.constant 0 : i32
    %c0_i32_0 = arith.constant 0 : i32
    %c0_i32_1 = arith.constant 0 : i32
    return %c0_i32, %c0_i32_0 : i32, i32
  }
  func.func @transform_12(%arg0: i32) -> (i32, i32, i32) {
    %c0_i32 = arith.constant 0 : i32
    %c0_i32_0 = arith.constant 0 : i32
    %c0_i32_1 = arith.constant 0 : i32
    return %arg0, %c0_i32, %c0_i32_0 : i32, i32, i32
  }
  func.func @transform_13(%arg0: i32) -> (i32, i32, i32) {
    %c0_i32 = arith.constant 0 : i32
    %c0_i32_0 = arith.constant 0 : i32
    %c0_i32_1 = arith.constant 0 : i32
    return %arg0, %c0_i32, %c0_i32_0 : i32, i32, i32
  }
}

</mosaic_0001>

<bundles_post_ra>
// kernel: tpu_custom_call.1
= control target key start
LH: loop header
LB: loop body
LE: loop exit
PB: predicated region body
PF: predicated region fallthrough
CT: control target
= control target key end

     0   :  { %s2338_s0 = inlined_call_operand.hbm [shape: f32[2,8,128], index: 0, kind: input, shape index: {}]   ;;  %s2339_s1 = inlined_call_operand.hbm [shape: f32[2,8,128], index: 1, kind: input, shape index: {}]   ;;  %s2340_s2 = inlined_call_operand.hbm [shape: f32[2,8,128], index: 2, kind: input, shape index: {}]   ;;  %s2341_s3 = inlined_call_operand.hbm [shape: f32[2,8,8], index: 3, kind: input, shape index: {}]   ;;  %s2342_s4 = inlined_call_operand.hbm [shape: bf16[128,128], index: 4, kind: input, shape index: {}]   ;;  %s2343_s5 = inlined_call_operand.vmem [shape: f32[1,128], index: 5, kind: input, shape index: {}]   ;;  %s2344_s6 = inlined_call_operand.hbm [shape: bf16[128,128], index: 6, kind: input, shape index: {}]   ;;  %s2345_s7 = inlined_call_operand.vmem [shape: f32[1,128], index: 7, kind: input, shape index: {}]   ;;  %s2346_s8 = inlined_call_operand.hbm [shape: bf16[128,128], index: 8, kind: input, shape index: {}]   ;;  %s2347_s9 = inlined_call_operand.vmem [shape: f32[1,128], index: 9, kind: input, shape index: {}]   ;;  %s2348_s10 = inlined_call_operand.hbm [shape: bf16[128,128], index: 10, kind: input, shape index: {}]   ;;  %s2349_s11 = inlined_call_operand.vmem [shape: f32[1,128], index: 11, kind: input, shape index: {}]   ;;  %s2350_s12 = inlined_call_operand.hbm [shape: f32[2,8,128], index: 12, kind: output, shape index: {0}]   ;;  %s2351_s13 = inlined_call_operand.hbm [shape: f32[2,8,8], index: 13, kind: output, shape index: {1}]  }
   0x1   :  { %2367 = sst [smem:[#allocation32_spill]] %s2339_s1 }
   0x2   :  { %2368 = sst [smem:[#allocation33_spill]] %s2342_s4 }
   0x3   :  { %2369 = sst [smem:[#allocation34_spill]] %s2344_s6 }
   0x4   :  { %2370 = sst [smem:[#allocation35_spill]] %s2346_s8 }
   0x5   :  { %2371 = sst [smem:[#allocation36_spill]] %s2348_s10 }
   0x6   :  { %2372 = sst [smem:[#allocation37_spill]] %s2349_s11 }
   0x7   :  { %2373 = sst [smem:[#allocation38_spill]] %s2350_s12 }
   0x8   :  { %2374 = sst [smem:[#allocation39_spill]] %s2351_s13 }
   0x9   :  { %19 = vsyncpa [#allocation3], 0 }
   0xa   :  { %21 = vsyncpa [#allocation3 + $0x1], 0 }
   0xb   :  { %22 = vsyncpa [#allocation6], 0 }
   0xc   :  { %24 = vsyncpa [#allocation6 + $0x1], 0 }
   0xd   :  { %25 = vsyncpa [#allocation9], 0 }
   0xe   :  { %27 = vsyncpa [#allocation9 + $0x1], 0 }
   0xf   :  { %28 = vsyncpa [#allocation12], 0 }
  0x10   :  { %29 = vsyncpa [#allocation15], 0 }
  0x11   :  { %30 = vsyncpa [#allocation4], 0 }
  0x12   :  { %32 = vsyncpa [#allocation4 + $0x1], 0 }
  0x13   :  { %33 = vsyncpa [#allocation18], 0 }
  0x14   :  { %35 = vsyncpa [#allocation18 + $0x1], 0  ;;  %s2034_s25 = smov 0   ;;  %s2036_s26 = smov 0  }
  0x15   :  { %s2038_s27 = smov 0   ;;  %s2040_s28 = smov 0  }
  0x16 LB: > { %2375 = sst [smem:[#allocation27_spill]] %s1944_s25  ;;  %s2055_s29 = sadd.s32 4294967295, %s1956_s28   ;;  %s1956_s28 = sphi %s2040_s28, %s2408_s28   ;;  %s1952_s27 = sphi %s2038_s27, %s2412_s27   ;;  %s1948_s26 = sphi %s2036_s26, %s2411_s26   ;;  %s1944_s25 = sphi %s2034_s25, %s2410_s25  }
  0x17   : > { %s1288_s30 = sadd.s32 4294967294, %s1956_s28   ;;  %p61_p0 = scmp.ne.s32.totalorder %s1948_s26, %s1944_s25 }
  0x18   : > { %p2363_p1 = scmp.eq.s32.totalorder %s2055_s29, 0  ;;  %p331_p2 = scmp.eq.s32.totalorder %s2055_s29, 1 }
  0x19   : > { %p337_p3 = scmp.eq.s32.totalorder %s1288_s30, 1  ;;  %p1289_p5 = scmp.ge.s32.totalorder %s1956_s28, 1 }
  0x1a   : > { %p2064_p4 = por %p2363_p1, %p61_p0  ;;  %p370_p7 = scmp.lt.s32.totalorder %s1956_s28, 3 }
  0x1b   : > { %p2069_p6 = por %p337_p3, %p61_p0  ;;  %s2379_s4 = sld [smem:[#allocation33_spill]] }
  0x1c   : > { %p2077_p8 = pnand %p1289_p5, %p370_p7  ;;  %s1958_s20 = smov [#allocation10]  }
  0x1d   : > { %s2377_s15 = scalar_select %p2069_p6, 1, 0 }
  0x1e   : > { %p1509_p9 = pneg %p2077_p8  ;;  %s383_s21 = sshll.u32 %s1958_s20, 4  ;;  %s384_s21 = int_to_ptr.vmem [resolvable:$true] %s383_s21 }
  0x1f   : > { %2378 = sst [smem:[#allocation28_spill]] %s2377_s15  ;;  %s2352_s16 = smov 64  }
  0x20   : > { %p2085_p10 = pnand %p1509_p9, %p2363_p1  ;;  %s2382_s6 = sld [smem:[#allocation34_spill]] }
  0x21   : > { %s381_s18 = sshll.u32 %s2379_s4, 4  ;;  %s2354_s17 = smov 4   ;;  %s382_s18 = int_to_ptr.hbm [resolvable:$true] %s381_s18 }
  0x22   : > { %1512 = dma.hbm_to_vmem [thread:$0]  (!%p2085_p10), %s382_s18, 1024, %s384_s21, [#allocation9], %s2352_s16, %s2352_s16, %s2354_s17  }
  0x23   : > { %s1961_s20 = smov [#allocation11]   ;;  %s2104_s23 = sadd.s32 1, %s1956_s28  }
  0x24   : > { %s400_s4 = sshll.u32 %s1961_s20, 4  ;;  %2383 = sst [smem:[#allocation29_spill]] %s2104_s23  ;;  %s401_s4 = int_to_ptr.vmem [resolvable:$true] %s400_s4 }
  0x25   : > { %s48_s24 = sadd.s32 1, %s1952_s27  ;;  %p55_p12 = scmp.ne.s32.totalorder %s1952_s27, %s1948_s26 }
  0x26   : > { %s398_s30 = sshll.u32 %s2382_s6, 4  ;;  %s45_s6 = ssub.s32 %s1956_s28, %s2104_s23  ;;  %s399_s30 = int_to_ptr.hbm [resolvable:$true] %s398_s30 }
  0x27   : > { %1515 = dma.hbm_to_vmem [thread:$0]  (!%p2085_p10), %s399_s30, 1024, %s401_s4, [#allocation12], %s2352_s16, %s2352_s16, %s2354_s17  }
  0x28   : > { %p46_p13 = scmp.eq.s32.totalorder %s45_s6, 0  ;;  %p56_p0 = scmp.eq.s32.totalorder %s1956_s28, 0 }
  0x29   : > { %p2114_p3 = por %p331_p2, %p55_p12  ;;  %p1546_p5 = scmp.lt.s32.totalorder %s1956_s28, 2 }
  0x2a   : > { %s2120_s21 = scalar_select %p46_p13, %s1952_s27, %s48_s24  }
  0x2b   : > { %s2384_s18 = scalar_select %p2114_p3, 1, 0 }
  0x2c   : > { %2386 = sst [smem:[#allocation31_spill]] %s2120_s21  ;;  %p57_p7 = por %p56_p0, %p55_p12 }
  0x2d   : > { %2385 = sst [smem:[#allocation30_spill]] %s2384_s18  ;;  %s2360_s20 = sand.u32 1, %s1952_s27  }
  0x2e   : > { %s2125_s4 = sshll.u32 %s2360_s20, 3  ;;  %s2128_s30 = sshll.u32 %s1956_s28, 3 }
  0x2f   : > { %p2130_p9 = pnand %p1546_p5, %p57_p7  ;;  %s2364_s16 = sand.u32 1, %s1956_s28  }
  0x30   : > { %s2388_s1 = sld [smem:[#allocation32_spill]]  ;;  %s474_s15 = scalar_lea.vmem [#allocation5], %s2125_s4 }
  0x31   : > { %s482_s25 = sshll.u32 %s474_s15, 4  ;;  %s2142_s20 = scalar_lea.sflag [#allocation6], %s2364_s16  ;;  %s483_s25 = int_to_ptr.vmem [resolvable:$true] %s482_s25 }
  0x32   : > { %p1662_p12 = pneg %p2130_p9 }
  0x36   : > { %s478_s24 = scalar_lea.hbm %s2388_s1, %s2128_s30 }
  0x37   : > { %s480_s21 = sshll.u32 %s478_s24, 4  ;;  %s1665_s24 = scalar_lea.hbm %s2388_s1, 16  ;;  %s481_s21 = int_to_ptr.hbm [resolvable:$true] %s480_s21 }
  0x38   : > { %s1658_s11 = sshra.s32 %s481_s21, 4  ;;  %s1659_s11 = int_to_ptr.hbm [resolvable:$true] %s1658_s11 }
  0x39   : > { %s1660_s12 = scalar_lea.hbm %s1659_s11, 8  ;;  %p1666_p5 = scmp.lt.s32.totalorder %s1659_s11, %s2388_s1 }
  0x3a   : > { %p1661_p2 = scmp.ne.s32.totalorder %s1659_s11, %s1660_s12  ;;  %p1667_p7 = scmp.lt.s32.totalorder %s1665_s24, %s1660_s12 }
  0x3c   : > { %p1663_p13 = pnand %p1662_p12, %p1661_p2  ;;  %p1668_p11 = por %p1667_p7, %p1666_p5 }
  0x3e   : > { %p1664_p0 = pneg %p1663_p13 }
  0x40   : > { %p1669_p1 = pnand %p1668_p11, %p1664_p0 }
  0x42   : > { %1672 = shalt.err (!%p1669_p1)
}
  0x43   : > { %1528 = dma.hbm_to_vmem [thread:$0]  (!%p2130_p9), %s481_s21, 128, %s483_s25, %s2142_s20  }
  0x44   : > { %s2389_s8 = sld [smem:[#allocation35_spill]]  ;;  %s1962_s23 = smov [#allocation13]  }
  0x45   : > { %s417_s11 = sshll.u32 %s1962_s23, 4  ;;  %s2390_s10 = sld [smem:[#allocation36_spill]]  ;;  %s418_s11 = int_to_ptr.vmem [resolvable:$true] %s417_s11 }
  0x46   : > { %s2391_s15 = smov 4   ;;  %s2392_s1 = smov 64  }
  0x47   : > { %s1963_s25 = smov [#allocation14]   ;;  %s455_s12 = scalar_lea.vmem [#allocation2], %s2125_s4 }
  0x48   : > { %s434_s21 = sshll.u32 %s1963_s25, 4  ;;  %s463_s13 = sshll.u32 %s455_s12, 4  ;;  %s435_s21 = int_to_ptr.vmem [resolvable:$true] %s434_s21  ;;  %s464_s13 = int_to_ptr.vmem [resolvable:$true] %s463_s13 }
  0x49   : > { %s1755_s18 = scalar_lea.hbm %s2338_s0, 16 }
  0x4a   : > { %s415_s17 = sshll.u32 %s2389_s8, 4  ;;  %s459_s8 = scalar_lea.hbm %s2338_s0, %s2128_s30  ;;  %s416_s17 = int_to_ptr.hbm [resolvable:$true] %s415_s17 }
  0x4b   : > { %s432_s24 = sshll.u32 %s2390_s10, 4  ;;  %s461_s23 = sshll.u32 %s459_s8, 4  ;;  %s433_s24 = int_to_ptr.hbm [resolvable:$true] %s432_s24  ;;  %s462_s23 = int_to_ptr.hbm [resolvable:$true] %s461_s23 }
  0x4c   : > { %1518 = dma.hbm_to_vmem [thread:$0]  (!%p2085_p10), %s416_s17, 1024, %s418_s11, [#allocation12], %s2392_s1, %s2392_s1, %s2391_s15  }
  0x4d   : > { %1521 = dma.hbm_to_vmem [thread:$0]  (!%p2085_p10), %s433_s24, 1024, %s435_s21, [#allocation15], %s2392_s1, %s2392_s1, %s2391_s15  }
  0x4e   : > { %s2393_s10 = sand.u32 1, %s1952_s27   ;;  %s1748_s11 = sshra.s32 %s462_s23, 4  ;;  %s1749_s11 = int_to_ptr.hbm [resolvable:$true] %s1748_s11 }
  0x4f   : > { %s452_s17 = scalar_lea.sflag [#allocation3], %s2393_s10  ;;  %s1750_s25 = scalar_lea.hbm %s1749_s11, 8 }
  0x50   : > { %p1751_p1 = scmp.ne.s32.totalorder %s1749_s11, %s1750_s25  ;;  %p1756_p10 = scmp.lt.s32.totalorder %s1749_s11, %s2338_s0 }
  0x51   : > { %p1757_p13 = scmp.lt.s32.totalorder %s1755_s18, %s1750_s25 }
  0x52   : > { %p1753_p11 = pnand %p1751_p1, %p1662_p12 }
  0x53   : > { %p1758_p0 = por %p1757_p13, %p1756_p10 }
  0x54   : > { %p1754_p2 = pneg %p1753_p11 }
  0x56   : > { %p1759_p5 = pnand %p1758_p0, %p1754_p2 }
  0x58   : > { %1762 = shalt.err (!%p1759_p5)
}
  0x59   : > { %1525 = dma.hbm_to_vmem [thread:$0]  (!%p2130_p9), %s462_s23, 128, %s464_s13, %s452_s17  }
  0x5a   : > { %s497_s15 = scalar_lea.hbm %s2340_s2, %s2128_s30  ;;  %s493_s12 = scalar_lea.vmem [#allocation7], %s2125_s4 }
  0x5b   : > { %s499_s21 = sshll.u32 %s497_s15, 4  ;;  %s501_s22 = sshll.u32 %s493_s12, 4  ;;  %s500_s21 = int_to_ptr.hbm [resolvable:$true] %s499_s21  ;;  %s502_s22 = int_to_ptr.vmem [resolvable:$true] %s501_s22 }
  0x5c   : > { %s1778_s11 = sshra.s32 %s500_s21, 4  ;;  %s1785_s23 = scalar_lea.hbm %s2340_s2, 16  ;;  %s1779_s11 = int_to_ptr.hbm [resolvable:$true] %s1778_s11 }
  0x5d   : > { %s1780_s25 = scalar_lea.hbm %s1779_s11, 8  ;;  %p1786_p2 = scmp.lt.s32.totalorder %s1779_s11, %s2340_s2 }
  0x5e   : > { %p1781_p7 = scmp.ne.s32.totalorder %s1779_s11, %s1780_s25  ;;  %p1787_p10 = scmp.lt.s32.totalorder %s1785_s23, %s1780_s25 }
  0x60   : > { %p1783_p1 = pnand %p1781_p7, %p1662_p12  ;;  %p1788_p13 = por %p1787_p10, %p1786_p2 }
  0x62   : > { %p1784_p11 = pneg %p1783_p1 }
  0x64   : > { %p1789_p0 = pnand %p1788_p13, %p1784_p11 }
  0x66   : > { %1792 = shalt.err (!%p1789_p0)
}
  0x67   : > { %1531 = dma.hbm_to_vmem [thread:$0]  (!%p2130_p9), %s500_s21, 128, %s502_s22, %s2142_s20  }
  0x68   : > { %s516_s10 = scalar_lea.hbm %s2341_s3, %s2128_s30  ;;  %s512_s15 = scalar_lea.vmem [#allocation8], %s2125_s4 }
  0x69   : > { %s518_s24 = sshll.u32 %s516_s10, 4  ;;  %s520_s12 = sshll.u32 %s512_s15, 4  ;;  %s519_s24 = int_to_ptr.hbm [resolvable:$true] %s518_s24  ;;  %s521_s12 = int_to_ptr.vmem [resolvable:$true] %s520_s12 }
  0x6a   : > { %s2394_s11 = sand.u32 1, %s1956_s28   ;;  %s1808_s16 = sshra.s32 %s519_s24, 4  ;;  %s1809_s16 = int_to_ptr.hbm [resolvable:$true] %s1808_s16 }
  0x6b   : > { %s509_s25 = scalar_lea.sflag [#allocation9], %s2394_s11  ;;  %s1810_s18 = scalar_lea.hbm %s1809_s16, 8 }
  0x6c   : > { %p1811_p5 = scmp.ne.s32.totalorder %s1809_s16, %s1810_s18  ;;  %s1815_s22 = scalar_lea.hbm %s2341_s3, 16 }
  0x6d   : > { %p1816_p11 = scmp.lt.s32.totalorder %s1809_s16, %s2341_s3  ;;  %p1817_p2 = scmp.lt.s32.totalorder %s1815_s22, %s1810_s18 }
  0x6e   : > { %p1813_p7 = pnand %p1811_p5, %p1662_p12 }
  0x6f   : > { %p1818_p10 = por %p1817_p2, %p1816_p11 }
  0x70   : > { %p1814_p1 = pneg %p1813_p7 }
  0x72   : > { %p1819_p13 = pnand %p1818_p10, %p1814_p1 }
  0x74   : > { %1822 = shalt.err (!%p1819_p13)
}
  0x75   : > { %1534 = dma.hbm_to_vmem [thread:$0]  (!%p2130_p9), %s519_s24, 128, %s521_s12, %s509_s25  }
  0x76   : > { %529 = sbr.rel (%p2077_p8) target bundleno = 977 (0x3d1), region = 68  ;;  %s2230_s4 = sand.u32 (!%p2077_p8), 1, %s1948_s26  }
  0x77   : > { %s2233_s13 = sshll.u32 (!%p2077_p8), %s2230_s4, 3  ;;  %s532_s17 = scalar_lea.sflag (!%p2077_p8), [#allocation3], %s2230_s4 }
  0x78   : > { %s535_s1 = scalar_lea.vmem (!%p2077_p8), [#allocation2], %s2233_s13 }
  0x7b   : > { %1911 = dma.done.wait (%p2064_p4), %s532_s17, 128  }
  0x7c   : > { %1913 = vsyncadd (%p2064_p4), %s532_s17, 4294967168  ;;  %s541_s19 = sand.u32 1, %s2055_s29   ;;  %s545_s8 = scalar_lea.vmem [#allocation5], %s2233_s13 }
  0x7d   : > { %s542_s6 = scalar_lea.sflag [#allocation6], %s541_s19 }
  0x7e   : > { %1915 = dma.done.wait (%p2064_p4), %s542_s6, 256  }
  0x7f   : > { %1917 = vsyncadd (%p2064_p4), %s542_s6, 4294967040  ;;  %s555_s10 = scalar_lea.vmem [#allocation7], %s2233_s13  ;;  %s562_s24 = scalar_lea.sflag [#allocation9], %s541_s19 }
  0x80   : > { %s565_s15 = scalar_lea.vmem [#allocation8], %s2233_s13 }
  0x81   : > { %1919 = dma.done.wait (%p2064_p4), %s562_s24, 128  }
  0x82   : > { %1921 = vsyncadd (%p2064_p4), %s562_s24, 4294967168  ;;  %p2395_p8 = scmp.eq.s32.totalorder %s2055_s29, 0 }
  0x84   : > { %1923 = dma.done.wait (%p2395_p8), [#allocation9], 1024   ;;  %p2396_p9 = pmov %p2395_p8 }
  0x85   : > { %p2397_p12 = pmov %p2395_p8 }
  0x86   : > { %1925 = vsyncadd (%p2396_p9), [#allocation9], 4294966272 }
  0x87   : > { %1927 = dma.done.wait (%p2397_p12), [#allocation12], 2048   ;;  %p2398_p0 = pmov %p2395_p8 }
  0x89   : > { %1929 = vsyncadd (%p2398_p0), [#allocation12], 4294965248  ;;  %p2399_p5 = pmov %p2398_p0 }
  0x8a   : > { %p2400_p7 = pmov %p2398_p0 }
  0x8b   : > { %1931 = dma.done.wait (%p2399_p5), [#allocation15], 1024  }
  0x8c   : > { %1933 = vsyncadd (%p2400_p7), [#allocation15], 4294966272  ;;  %v1464_v0 = vld [vmem:[#allocation11 + $0x38] sm:$0xff]  ;;  %v1463_v2 = vld [vmem:[#allocation11 + $0x30] sm:$0xff]  ;;  %vm916_vm0 = vcmask 64512   ;;  %vm945_vm1 = vcmask 1043456  }
  0x8d   : > { %v1456_v1 = vld [vmem:[#allocation10 + $0x38] sm:$0xff]  ;;  %805 = vmatpush.bf16.msra.mxu1 %v1464_v0  ;;  %v1455_v3 = vld [vmem:[#allocation10 + $0x30] sm:$0xff]  ;;  %v1462_v4 = vld [vmem:[#allocation11 + $0x28] sm:$0xff]  ;;  %s648_s20 = scalar_lea.vmem [#allocation17], %s2233_s13  ;;  %s1445_s22 = sshll.u32 %s2055_s29, 3 }
  0x8e   : > { %724 = vmatpush.bf16.msra.mxu0 %v1456_v1  ;;  %v1454_v5 = vld [vmem:[#allocation10 + $0x28] sm:$0xff]  ;;  %v1461_v6 = vld [vmem:[#allocation11 + $0x20] sm:$0xff]  ;;  %v1460_v8 = vld [vmem:[#allocation11 + $0x18] sm:$0xff]  ;;  %s2402_s17 = sld [smem:[#allocation39_spill]]  ;;  %s1078_s19 = sshll.u32 %s648_s20, 4  ;;  %s1079_s19 = int_to_ptr.vmem [resolvable:$true] %s1078_s19 }
  0x8f   : > { %v1453_v7 = vld [vmem:[#allocation10 + $0x20] sm:$0xff]  ;;  %v1452_v9 = vld [vmem:[#allocation10 + $0x18] sm:$0xff]  ;;  %v1459_v10 = vld [vmem:[#allocation11 + $0x10] sm:$0xff] }
  0x90   : > { %v1451_v11 = vld [vmem:[#allocation10 + $0x10] sm:$0xff]  ;;  %v1458_v12 = vld [vmem:[#allocation11 + $0x8] sm:$0xff]  ;;  %v1457_v14 = vld [vmem:[#allocation11] sm:$0xff] }
  0x91   : > { %806 = vmatpush.bf16.msra.mxu1 %v1463_v2  ;;  %v1450_v13 = vld [vmem:[#allocation10 + $0x8] sm:$0xff]  ;;  %v652_v15 = vld [vmem:[%s545_s8] sm:$0xff]  ;;  %v1449_v16 = vld [vmem:[#allocation10] sm:$0xff]  ;;  %s1052_s8 = scalar_lea.sflag [#allocation18], %s2230_s4 }
  0x92   : > { %725 = vmatpush.bf16.msra.mxu0 %v1455_v3  ;;  %v650_v17 = vld [vmem:[%s535_s1] sm:$0xff]  ;;  %v653_v18 = vpack.c.bf16 %v652_v15, %v652_v15  ;;  %v1472_v30 = vld [vmem:[#allocation13 + $0x38] sm:$0xff]  ;;  %v1471_v31 = vld [vmem:[#allocation13 + $0x30] sm:$0xff] }
  0x93   : > { %v651_v19 = vpack.c.bf16 %v650_v17, %v650_v17  ;;  %v1590_v20 = vld [vmem:[%s2345_s7] ss:$0 sm:$0xff]  ;;  %886 = vmatpush.bf16.msra.mxu2 %v1472_v30  ;;  %v1470_v32 = vld [vmem:[#allocation13 + $0x28] sm:$0xff]  ;;  %v1468_v34 = vld [vmem:[#allocation13 + $0x18] sm:$0xff] }
  0x94   : > { %v1591_v22 = vld [vmem:[%s2343_s5] ss:$0 sm:$0xff]  ;;  %v1467_v35 = vld [vmem:[#allocation13 + $0x10] sm:$0xff]  ;;  %v1466_v41 = vld [vmem:[#allocation13 + $0x8] sm:$0xff]  ;;  %s1076_s1 = scalar_lea.hbm %s2402_s17, %s1445_s22  ;;  %s1858_s29 = scalar_lea.hbm %s2402_s17, 16 }
  0x95   : > { %807 = vmatpush.bf16.msra.mxu1 %v1462_v4  ;;  %v1469_v33 = vld [vmem:[#allocation13 + $0x20] sm:$0xff]  ;;  %v902_v36 = vld [vmem:[%s565_s15] sm:$0xff]  ;;  %v1478_v58 = vld [vmem:[#allocation14 + $0x28] sm:$0xff]  ;;  %s1080_s6 = sshll.u32 %s1076_s1, 4  ;;  %s1081_s6 = int_to_ptr.hbm [resolvable:$true] %s1080_s6 }
  0x96   : > { %726 = vmatpush.bf16.msra.mxu0 %v1454_v5  ;;  %v1465_v42 = vld [vmem:[#allocation13] sm:$0xff]  ;;  %v1480_v56 = vld [vmem:[#allocation14 + $0x38] sm:$0xff]  ;;  %v1479_v57 = vld [vmem:[#allocation14 + $0x30] sm:$0xff] }
  0x97   : > { %887 = vmatpush.bf16.msra.mxu2 %v1471_v31  ;;  %v654_v43 = vld [vmem:[%s555_s10] sm:$0xff]  ;;  %v1476_v61 = vld [vmem:[#allocation14 + $0x18] sm:$0xff]  ;;  %v1475_v0 = vld [vmem:[#allocation14 + $0x10] sm:$0xff]  ;;  %s1852_s10 = sshra.s32 %s1081_s6, 4  ;;  %s1853_s10 = int_to_ptr.hbm [resolvable:$true] %s1852_s10 }
  0x98   : > { %v655_v44 = vpack.c.bf16 %v654_v43, %v654_v43  ;;  %v1592_v51 = vld [vmem:[%s2347_s9] ss:$0 sm:$0xff]  ;;  %v1474_v5 = vld [vmem:[#allocation14 + $0x8] sm:$0xff]  ;;  %s1854_s24 = scalar_lea.hbm %s1853_s10, 8  ;;  %p1859_p2 = scmp.lt.s32.totalorder %s1853_s10, %s2402_s17 }
  0x99   : > { %808 = vmatpush.bf16.msra.mxu1 %v1461_v6  ;;  %v1477_v60 = vld [vmem:[#allocation14 + $0x20] sm:$0xff]  ;;  %p1855_p4 = scmp.ne.s32.totalorder %s1853_s10, %s1854_s24  ;;  %p1860_p10 = scmp.lt.s32.totalorder %s1858_s29, %s1854_s24 }
  0x9a   : > { %727 = vmatpush.bf16.msra.mxu0 %v1453_v7 }
  0x9b   : > { %888 = vmatpush.bf16.msra.mxu2 %v1470_v32  ;;  %p1856_p1 = pnand %p1855_p4, %p2114_p3  ;;  %p1861_p13 = por %p1860_p10, %p1859_p2 }
  0x9d   : > { %809 = vmatpush.bf16.msra.mxu1 %v1460_v8  ;;  %p1857_p11 = pneg %p1856_p1 }
  0x9e   : > { %728 = vmatpush.bf16.msra.mxu0 %v1452_v9 }
  0x9f   : > { %889 = vmatpush.bf16.msra.mxu2 %v1469_v33  ;;  %p1862_p8 = pnand %p1861_p13, %p1857_p11 }
  0xa1   : > { %810 = vmatpush.bf16.msra.mxu1 %v1459_v10 }
  0xa2   : > { %729 = vmatpush.bf16.msra.mxu0 %v1451_v11 }
  0xa3   : > { %890 = vmatpush.bf16.msra.mxu2 %v1468_v34 }
  0xa5   : > { %811 = vmatpush.bf16.msra.mxu1 %v1458_v12  ;;  %v1473_v12 = vld [vmem:[#allocation14] sm:$0xff] }
  0xa6   : > { %730 = vmatpush.bf16.msra.mxu0 %v1450_v13 }
  0xa7   : > { %891 = vmatpush.bf16.msra.mxu2 %v1467_v35 }
  0xa9   : > { %812 = vmatpush.bf16.msra.mxu1 %v1457_v14 }
  0xaa   : > { %731 = vmatpush.bf16.msra.mxu0 %v1449_v16 }
  0xab   : > { %892 = vmatpush.bf16.msra.mxu2 %v1466_v41 }
  0xac   : > { %813 = vmatmul.bf16.vlgmr.msra.gmra.mxu1 %v653_v18 }
  0xad   : > { %732 = vmatmul.bf16.vlgmr.msra.gmra.mxu0 %v651_v19 }
  0xaf   : > { %893 = vmatpush.bf16.msra.mxu2 %v1465_v42 }
  0xb2   : > { %894 = vmatmul.bf16.vlgmr.msra.gmra.mxu2 %v655_v44 }
 0x129   : > { %v814_v21 = vpop.f32.mrf.mxu1 }
 0x12a   : > { %v733_v23 = vpop.f32.mrf.mxu0  ;;  %v815_v24 = vadd.f32 %v1590_v20, %v814_v21 }
 0x12b   : > { %v734_v26 = vadd.f32 %v1591_v22, %v733_v23 }
 0x12c   : > { %v900_v25 = vpack.c.bf16 %v815_v24, %v815_v24 }
 0x12d   : > { %v899_v27 = vpack.c.bf16 %v734_v26, %v734_v26 }
 0x12e   : > { %910 = vmatpush.bf16.xpose.msrb.mxu0 %v900_v25 }
 0x131   : > { %v816_v28 = vpop.f32.mrf.mxu1 }
 0x132   : > { %v735_v29 = vpop.f32.mrf.mxu0 }
 0x135   : > { %911 = vmatmul.bf16.vlgmr.msrb.gmra.mxu0 %v899_v27  ;;  %v895_v50 = vpop.f32.mrf.mxu2 }
 0x136   : > { %v896_v53 = vadd.f32 %v1592_v51, %v895_v50 }
 0x138   : > { %v901_v54 = vpack.c.bf16 %v896_v53, %v896_v53 }
 0x13a   : > { %v947_v55 = vsel %vm945_vm1, %v901_v54, 0 }
 0x13b   : > { %956 = vmatpush.bf16.msra.mxu3 %v947_v55 }
 0x13d   : > { %v897_v52 = vpop.f32.mrf.mxu2 }
 0x13f   : > { %1031 = vmatpush.bf16.msrb.mxu3 %v1480_v56 }
 0x143   : > { %1032 = vmatpush.bf16.msrb.mxu3 %v1479_v57 }
 0x147   : > { %1033 = vmatpush.bf16.msrb.mxu3 %v1478_v58 }
 0x14b   : > { %1034 = vmatpush.bf16.msrb.mxu3 %v1477_v60 }
 0x14f   : > { %1035 = vmatpush.bf16.msrb.mxu3 %v1476_v61 }
 0x153   : > { %1036 = vmatpush.bf16.msrb.mxu3 %v1475_v0 }
 0x157   : > { %1037 = vmatpush.bf16.msrb.mxu3 %v1474_v5 }
 0x15b   : > { %1038 = vmatpush.bf16.msrb.mxu3 %v1473_v12 }
 0x1b2   : > { %v912_v37 = vpop.f32.mrf.mxu0 }
 0x1b3   : > { %v913_v38 = vadd.f32 %v912_v37, %v902_v36 }
 0x1b5   : > { %v917_v39 = vsel %vm916_vm0, %v913_v38, -inf }
 0x1b6   : > { %918 = vmax.xlane.f32.xlu0 %v917_v39 }
 0x1ba   : > { %v914_v40 = vpop.f32.mrf.mxu0 }
 0x229   : > { %v919_v45 = vpop.xlane.xlu0 %918 }
 0x22a   : > { %v920_v46 = vsub.f32 %v913_v38, %v919_v45 }
 0x22c   : > { %v921_v47 = vmul.f32 1.442695, %v920_v46 }
 0x22e   : > { %1594 = vpow2.f32 %v921_v47 }
 0x234   : > { %v1595_v48 = vpop.eup %1594 }
 0x235   : > { %v923_v49 = vsel %vm916_vm0, %v1595_v48, 0.0 }
 0x236   : > { %924 = vadd.xlane.f32.xlu0 %v923_v49 }
 0x2a9   : > { %v925_v59 = vpop.xlane.xlu0 %924 }
 0x2aa   : > { %1596 = vrcp.f32 %v925_v59  ;;  %v937_v2 = vand.u32 2147483648, %v925_v59  ;;  %v935_v4 = vand.u32 2147483647, %v925_v59  ;;  %vm931_vm3 = vweird.f32 %v925_v59 }
 0x2ac   : > { %v938_v7 = vor.u32 1.1754944e-38, %v937_v2  ;;  %vm936_vm5 = vcmp.eq.f32.partialorder %v935_v4, 8.507059e+37 }
 0x2b0   : > { %v1597_v62 = vpop.eup %1596 }
 0x2b1   : > { %v927_v63 = vmul.f32 %v1597_v62, %v925_v59  ;;  %vm932_vm2 = vweird.f32 %v1597_v62 }
 0x2b2   : > { %vm933_vm4 = vmor %vm931_vm3, %vm932_vm2 }
 0x2b3   : > { %v928_v1 = vsub.f32 1.0, %v927_v63 }
 0x2b5   : > { %v929_v3 = vmul.f32 %v1597_v62, %v928_v1 }
 0x2b7   : > { %v930_v6 = vadd.f32 %v1597_v62, %v929_v3 }
 0x2b9   : > { %v934_v8 = vsel %vm933_vm4, %v1597_v62, %v930_v6 }
 0x2ba   : > { %v939_v9 = vsel %vm936_vm5, %v938_v7, %v934_v8 }
 0x2bb   : > { %v940_v10 = vmul.f32 %v1595_v48, %v939_v9 }
 0x2bd   : > { %v941_v11 = vpack.c.bf16 %v940_v10, %v940_v10  ;;  %1045 = vst.msk [vmem:[%s648_s20] sm:$0xff] %vm916_vm0, %v940_v10 }
 0x2bf   : > { %1410 = vmatmul.msk.bf16.vlgmr.msra.gmra.mxu3 %vm916_vm0, %v941_v11 }
 0x342   : > { %v958_v13 = vpop.f32.mrf.mxu3 }
 0x343   : > { %v962_v14 = vpack.c.bf16 %v958_v13, %v958_v13 }
 0x345   : > { %1039 = vmatmul.bf16.vlgmr.msrb.gmra.mxu3 %v962_v14 }
 0x34a   : > { %v960_v15 = vpop.f32.mrf.mxu3 }
 0x34b   : > { %1865 = shalt.err (!%p1862_p8)
}
 0x34c   : > { %1506 = dma.vmem_to_hbm [thread:$0]  (%p2114_p3), %s1079_s19, 128, %s1081_s6, %s1052_s8  }
 0x34d   : > { %s2403_s18 = sld [smem:[#allocation38_spill]]  ;;  %s641_s15 = scalar_lea.vmem [#allocation16], %s2233_s13 }
 0x34e   : > { %s2404_s1 = sld [smem:[#allocation37_spill]]  ;;  %s1064_s10 = sshll.u32 %s641_s15, 4  ;;  %s1065_s10 = int_to_ptr.vmem [resolvable:$true] %s1064_s10 }
 0x34f   : > { %s1047_s14 = scalar_lea.sflag [#allocation4], %s2230_s4 }
 0x353   : > { %s1062_s20 = scalar_lea.hbm %s2403_s18, %s1445_s22  ;;  %s1886_s8 = scalar_lea.hbm %s2403_s18, 16 }
 0x354   : > { %v1593_v16 = vld [vmem:[%s2404_s1] ss:$0 sm:$0xff]  ;;  %s1066_s24 = sshll.u32 %s1062_s20, 4  ;;  %s1067_s24 = int_to_ptr.hbm [resolvable:$true] %s1066_s24 }
 0x355   : > { %s1880_s29 = sshra.s32 %s1067_s24, 4  ;;  %s1881_s29 = int_to_ptr.hbm [resolvable:$true] %s1880_s29 }
 0x356   : > { %s1882_s19 = scalar_lea.hbm %s1881_s29, 8  ;;  %p1887_p5 = scmp.lt.s32.totalorder %s1881_s29, %s2403_s18 }
 0x357   : > { %p1883_p9 = scmp.ne.s32.totalorder %s1881_s29, %s1882_s19  ;;  %p1888_p7 = scmp.lt.s32.totalorder %s1886_s8, %s1882_s19 }
 0x359   : > { %p1884_p12 = pnand %p1883_p9, %p2114_p3  ;;  %p1889_p4 = por %p1888_p7, %p1887_p5 }
 0x35b   : > { %p1885_p0 = pneg %p1884_p12 }
 0x35d   : > { %p1890_p1 = pnand %p1889_p4, %p1885_p0 }
 0x3c8   : > { %v1040_v17 = vpop.f32.mrf.mxu3 }
 0x3c9   : > { %v1041_v18 = vadd.f32 %v1593_v16, %v1040_v17 }
 0x3cb   : > { %1044 = vst [vmem:[%s641_s15] sm:$0xff] %v1041_v18 }
 0x3cc   : > { %1893 = shalt.err (!%p1890_p1)
}
 0x3cd   : > { %1505 = dma.vmem_to_hbm [thread:$0]  (%p2114_p3), %s1065_s10, 128, %s1067_s24, %s1047_s14  }
 0x3d0   : > { %v1042_v19 = vpop.f32.mrf.mxu3 }
 0x3d1 PF: > { %s2405_s4 = sld [smem:[#allocation27_spill]]  ;;  %p2407_p11 = scmp.ge.s32.totalorder %s1956_s28, 2 }
 0x3d3   : > { %p1536_p2 = pnand %p2407_p11, %p2069_p6 }
 0x3d5   : > { %p1537_p10 = pneg %p1536_p2 }
 0x3d7   : > { %s1092_s25 = sand.u32 1, %s2405_s4  }
 0x3d8   : > { %s1093_s16 = scalar_lea.sflag [#allocation4], %s1092_s25 }
 0x3d9   : > { %1935 = dma.done.wait (%p1537_p10), %s1093_s16, 128  }
 0x3da   : > { %1937 = vsyncadd (%p1537_p10), %s1093_s16, 4294967168  ;;  %s1103_s20 = scalar_lea.sflag [#allocation18], %s1092_s25 }
 0x3db   : > { %1939 = dma.done.wait (%p1537_p10), %s1103_s20, 128  }
 0x3dc   : > { %1941 = vsyncadd (%p1537_p10), %s1103_s20, 4294967168  ;;  %s2408_s28 = sld [smem:[#allocation29_spill]]  ;;  %s2410_s25 = smov %s1948_s26 }
 0x3dd   : > { %s2409_s21 = sld [smem:[#allocation31_spill]]  ;;  %s2411_s26 = smov %s1952_s27 }
 0x3e2   : > { %p38_p3 = scmp.ge.s32.totalorder %s2408_s28, 4  }
 0x3e3   : > { %s2412_s27 = smov %s2409_s21 }
 0x3e4   :  { %40 = sbr.rel (!%p38_p3) target bundleno = 22 (0x16), region = 183 }
 0x3e9   :  { %1109 = vsyncpa [#allocation3], 1 }
 0x3ea   :  { %1111 = vsyncpa [#allocation3 + $0x1], 1 }
 0x3eb   :  { %1112 = vsyncpa [#allocation6], 1 }
 0x3ec   :  { %1114 = vsyncpa [#allocation6 + $0x1], 1 }
 0x3ed   :  { %1115 = vsyncpa [#allocation9], 1 }
 0x3ee   :  { %1117 = vsyncpa [#allocation9 + $0x1], 1 }
 0x3ef   :  { %1118 = vsyncpa [#allocation12], 1 }
 0x3f0   :  { %1119 = vsyncpa [#allocation15], 1 }
 0x3f1   :  { %1120 = vsyncpa [#allocation4], 1 }
 0x3f2   :  { %1122 = vsyncpa [#allocation4 + $0x1], 1 }
 0x3f3   :  { %1123 = vsyncpa [#allocation18], 1 }
 0x3f4   :  { %1125 = vsyncpa [#allocation18 + $0x1], 1 }

</bundles_post_ra>
